<compile_context>
chip_gen: v7x
topology: tpu7x:2x2x1
jax: 0.10.0
libtpu: 0.0.40
codegen_flags: <defaults>
</compile_context>

<pallas_src>
import functools
import math

import jax
import jax.numpy as jnp
from jax.experimental import pallas as pl
from jax.experimental.pallas import tpu as pltpu


def _round_up(x, m):
    return ((x + m - 1) // m) * m


def _device_kind():
    try:
        return jax.devices()[0].device_kind.lower()
    except Exception:
        return ""


def _upsample_conv_kernel(w_ref, b_ref, x_ref, o_ref, s_ref, *, wp):
    """One batch tile, one Cout tile.

    w_ref: (4*CoT, 9*Cin_p) bf16  folded weights; row = co*4 + (dy*2+dx),
                                  col = (ty*3+tx)*Cin_p + ci (tap offset = t-1)
    b_ref: (4*CoT, 1)       f32   bias repeated once per phase
    x_ref: (B_t, Cin_p, Lp)       zero-padded, row-flattened images
    o_ref: (B_t, 4*CoT, Lc_p)     phase-separated flat output, row stride wp=W+2
    s_ref: (9*Cin_p, B_t*Lc_p) bf16  scratch: the 9 tap views stacked on sublanes
    """
    bt, cinp, _ = x_ref.shape
    lcp = o_ref.shape[2]

    # Stage the 9 tap slices of every image in the batch tile.  Every store is
    # 8-aligned on sublanes (Cin_p % 8 == 0) and 128-aligned on lanes
    # (Lc_p % 128 == 0): clean unmasked full-tile stores.
    for b in range(bt):
        for ty in range(3):
            for tx in range(3):
                k = ty * 3 + tx
                base = ty * wp + tx
                s_ref[k * cinp:(k + 1) * cinp, b * lcp:(b + 1) * lcp] = (
                    x_ref[b, :, pl.ds(base, lcp)].astype(s_ref.dtype))

    # Single bf16 x bf16 -> f32 MXU matmul for all phases / channels / images.
    acc = jnp.dot(w_ref[...], s_ref[...], preferred_element_type=jnp.float32)
    acc = acc + b_ref[...]

    for b in range(bt):
        o_ref[b] = acc[:, b * lcp:(b + 1) * lcp].astype(o_ref.dtype)


def _fold_upsample_into_weights(weight, cin_pad):
    """(Cout, Cin, 3, 3) -> (4*Cout, 9*cin_pad) bf16 folded per-phase weights.

    For output pixel (2*oy+dy, 2*ox+dx) the upsample+conv reads original pixels
    at offsets (ty-1, tx-1); a[d, k, t] == 1 iff kernel index k maps to tap t for
    phase d (d=0 -> taps {-1,0,0}; d=1 -> taps {0,0,+1}).
    """
    cout, cin = weight.shape[0], weight.shape[1]
    a = jnp.array([[[1, 0, 0], [0, 1, 0], [0, 1, 0]],
                   [[0, 1, 0], [0, 1, 0], [0, 0, 1]]], jnp.float32)
    wf = jnp.einsum('oikl,ykt,xlu->oyxtui', weight.astype(jnp.float32), a, a)
    wf = jnp.pad(wf, ((0, 0),) * 5 + ((0, cin_pad - cin),))   # zero-pad Cin per tap
    return wf.reshape(4 * cout, 9 * cin_pad).astype(jnp.bfloat16)


def _pick_cout_tile(cout, kind):
    # Fill the MXU M dimension: 256 rows (CoT=64) on v6e/v7x, 128 rows (CoT=32)
    # on v5e (128x128 MXUs; larger M there only adds VMEM/output pressure).
    cap = 32 if "v5" in kind else 64
    if cout <= cap:
        return cout
    for t in (64, 32, 16, 8, 4, 2):
        if t <= cap and cout % t == 0:
            return t
    return cout


def _vmem_bytes(bt, cot, cinp, lpin_pad, lc_pad, x_itemsize, out_itemsize):
    w_b = 4 * cot * 9 * cinp * 2                 # bf16 folded weights
    b_b = 4 * cot * 128 * 4                      # bias block (lane-padded to 128)
    x_b = bt * cinp * lpin_pad * x_itemsize
    o_b = bt * 4 * cot * lc_pad * out_itemsize
    s_b = 9 * cinp * bt * lc_pad * 2             # bf16 scratch
    return 2 * (w_b + b_b + x_b + o_b) + s_b     # in/out blocks double-buffer


def _pick_batch_tile(n, cot, cinp, lpin_pad, lc_pad, x_itemsize, out_itemsize,
                     budget_bytes):
    # Fewer, fatter grid steps (bigger matmul N) while staying inside VMEM.
    for bt in range(min(n, 8), 0, -1):
        if n % bt:
            continue
        if _vmem_bytes(bt, cot, cinp, lpin_pad, lc_pad,
                       x_itemsize, out_itemsize) <= budget_bytes:
            return bt
    return 1


def upsample_conv(x, weight, bias):
    """x: (N, Cin, H, W), weight: (Cout, Cin, 3, 3), bias: (Cout,) -> (N, Cout, 2H, 2W)."""
    n, cin, h, w = x.shape
    cout = weight.shape[0]

    wp = w + 2                                   # padded row width (2 junk cols/row)
    lc = h * wp                                  # flat output length per phase
    lc_pad = _round_up(lc, 128)                  # lane-dense output/scratch rows
    cinp = _round_up(cin, 8)                     # sublane-aligned tap blocks
    lpin_pad = _round_up(2 * wp + 2 + lc_pad, 128)   # keeps every tap slice in-bounds

    kind = _device_kind()
    cot = _pick_cout_tile(cout, kind)
    vmem_cap = (48 << 20) if "v7" in kind else (100 << 20)
    bt = _pick_batch_tile(n, cot, cinp, lpin_pad, lc_pad,
                          x.dtype.itemsize, x.dtype.itemsize,
                          budget_bytes=min(vmem_cap, 48 << 20))
    est = _vmem_bytes(bt, cot, cinp, lpin_pad, lc_pad,
                      x.dtype.itemsize, x.dtype.itemsize)
    vmem_limit = int(min(max(int(est * 1.5), 32 << 20), vmem_cap))

    # Layout plumbing only (no 4x upsampled array): zero-pad the border, pad Cin
    # up to a sublane multiple, row-flatten, tail-pad to a lane multiple.
    x_pad = jnp.pad(x, ((0, 0), (0, cinp - cin), (1, 1), (1, 1)))
    x_flat = x_pad.reshape(n, cinp, (h + 2) * wp)
    x_flat = jnp.pad(x_flat, ((0, 0), (0, 0), (0, lpin_pad - (h + 2) * wp)))

    w_all = _fold_upsample_into_weights(weight, cinp)             # (4*Cout, 9*Cin_p) bf16
    b_all = jnp.repeat(bias.astype(jnp.float32), 4)[:, None]      # (4*Cout, 1)

    # TODO(synk): for very large Cin/H (scratch = 9*Cin_p*B_t*Lc_p bf16) add a
    # row-tile grid axis over H so the working set stays inside v7x's 64 MiB VMEM
    # and feeds both of its TensorCores with enough parallel grid steps.
    out_flat = pl.pallas_call(
        functools.partial(_upsample_conv_kernel, wp=wp),
        out_shape=jax.ShapeDtypeStruct((n, 4 * cout, lc_pad), x.dtype),
        grid_spec=pltpu.PrefetchScalarGridSpec(
            num_scalar_prefetch=0,
            grid=(n // bt, cout // cot),
            in_specs=[
                pl.BlockSpec((4 * cot, 9 * cinp), lambda i, j: (j, 0)),      # weights
                pl.BlockSpec((4 * cot, 1), lambda i, j: (j, 0)),             # bias
                pl.BlockSpec((bt, cinp, lpin_pad), lambda i, j: (i, 0, 0)),  # images
            ],
            out_specs=pl.BlockSpec((bt, 4 * cot, lc_pad), lambda i, j: (i, j, 0)),
            scratch_shapes=[pltpu.VMEM((9 * cinp, bt * lc_pad), jnp.bfloat16)],
        ),
        compiler_params=pltpu.CompilerParams(
            dimension_semantics=("parallel", "parallel"),
            vmem_limit_bytes=vmem_limit),
    )(w_all, b_all, x_flat)

    # Un-phase: rows are co*4 + dy*2 + dx, flat cols are oy*wp + ox (junk cols and
    # the Lc pad are dropped).  TODO(synk): a consumer that accepts the
    # phase-separated layout can skip this extra HBM round trip.
    y = out_flat[:, :, :lc].reshape(n, cout, 2, 2, h, wp)[..., :w]
    y = y.transpose(0, 1, 4, 2, 5, 3).reshape(n, cout, 2 * h, 2 * w)
    return y


def _reference(x, weight, bias):
    x_up = jnp.repeat(jnp.repeat(x, 2, axis=2), 2, axis=3)
    y = jax.lax.conv_general_dilated(
        x_up, weight, window_strides=(1, 1), padding=((1, 1), (1, 1)),
        dimension_numbers=("NCHW", "OIHW", "NCHW"),
        precision=jax.lax.Precision.HIGHEST)
    return y + bias[None, :, None, None]


if __name__ == "__main__":
    batch, in_channels, out_channels, spatial = 2, 4, 8, 16

    key = jax.random.PRNGKey(0)
    kx, kw, kb = jax.random.split(key, 3)

    x = jax.random.normal(kx, (batch, in_channels, spatial, spatial), jnp.float32)

    # Deterministic init matching nn.Conv2d default (Kaiming-uniform bound).
    fan_in = in_channels * 3 * 3
    bound = 1.0 / math.sqrt(fan_in)
    weight = jax.random.uniform(kw, (out_channels, in_channels, 3, 3),
                                jnp.float32, minval=-bound, maxval=bound)
    bias = jax.random.uniform(kb, (out_channels,), jnp.float32,
                              minval=-bound, maxval=bound)

    out = jax.block_until_ready(upsample_conv(x, weight, bias))
    ref = jax.block_until_ready(_reference(x, weight, bias))

    assert out.shape == (batch, out_channels, 2 * spatial, 2 * spatial), out.shape
    max_err = float(jnp.max(jnp.abs(out - ref)))
    # bf16 MXU operands with f32 accumulation: expected max abs error ~1e-2 at
    # these magnitudes (precision/perf tradeoff per review, not a bug).
    assert jnp.allclose(out, ref, atol=3e-2, rtol=3e-2), max_err

    print("KERNEL_OK")
</pallas_src>

<mosaic_0001>
module attributes {stable_mosaic.version = 11 : i64} {
  func.func @_upsample_conv_kernel(%arg0: i32, %arg1: i32, %arg2: memref<32x72xbf16, #tpu.memory_space<vmem>>, %arg3: memref<32x1xf32, #tpu.memory_space<vmem>>, %arg4: memref<2x8x512xf32, #tpu.memory_space<vmem>>, %arg5: memref<2x32x384xf32, #tpu.memory_space<vmem>>, %arg6: memref<72x768xbf16, #tpu.memory_space<vmem>>) attributes {dimension_semantics = [#tpu.dimension_semantics<parallel>, #tpu.dimension_semantics<parallel>], iteration_bounds = array<i64: 1, 1>, scalar_prefetch = 0 : i64, scratch_operands = 1 : i64, tpu.core_type = #tpu.core_type<tc>, window_params = [{transform_indices = @transform_0, window_bounds = array<i64: 32, 72>}, {transform_indices = @transform_1, window_bounds = array<i64: 32, 1>}, {transform_indices = @transform_2, window_bounds = array<i64: 2, 8, 512>}, {transform_indices = @transform_3, window_bounds = array<i64: 2, 32, 384>}]} {
    %c0 = arith.constant 0 : index
    %c0_0 = arith.constant 0 : index
    %c0_1 = arith.constant 0 : index
    %0 = vector.load %arg4[%c0, %c0_0, %c0_1] : memref<2x8x512xf32, #tpu.memory_space<vmem>>, vector<1x8x384xf32>
    %1 = vector.shape_cast %0 : vector<1x8x384xf32> to vector<8x384xf32>
    %2 = arith.truncf %1 : vector<8x384xf32> to vector<8x384xbf16>
    %c0_2 = arith.constant 0 : index
    %c0_3 = arith.constant 0 : index
    %3 = vector.load %arg6[%c0_2, %c0_3] : memref<72x768xbf16, #tpu.memory_space<vmem>>, vector<8x384xbf16>
    tpu.vector_store %arg6[%c0_2, %c0_3], %2 {strides = array<i32>} : memref<72x768xbf16, #tpu.memory_space<vmem>>, vector<8x384xbf16>,
    %c0_4 = arith.constant 0 : index
    %c0_5 = arith.constant 0 : index
    %c1 = arith.constant 1 : index
    %4 = vector.load %arg4[%c0_4, %c0_5, %c1] : memref<2x8x512xf32, #tpu.memory_space<vmem>>, vector<1x8x384xf32>
    %5 = vector.shape_cast %4 : vector<1x8x384xf32> to vector<8x384xf32>
    %6 = arith.truncf %5 : vector<8x384xf32> to vector<8x384xbf16>
    %c8 = arith.constant 8 : index
    %c0_6 = arith.constant 0 : index
    %7 = vector.load %arg6[%c8, %c0_6] : memref<72x768xbf16, #tpu.memory_space<vmem>>, vector<8x384xbf16>
    tpu.vector_store %arg6[%c8, %c0_6], %6 {strides = array<i32>} : memref<72x768xbf16, #tpu.memory_space<vmem>>, vector<8x384xbf16>,
    %c0_7 = arith.constant 0 : index
    %c0_8 = arith.constant 0 : index
    %c2 = arith.constant 2 : index
    %8 = vector.load %arg4[%c0_7, %c0_8, %c2] : memref<2x8x512xf32, #tpu.memory_space<vmem>>, vector<1x8x384xf32>
    %9 = vector.shape_cast %8 : vector<1x8x384xf32> to vector<8x384xf32>
    %10 = arith.truncf %9 : vector<8x384xf32> to vector<8x384xbf16>
    %c16 = arith.constant 16 : index
    %c0_9 = arith.constant 0 : index
    %11 = vector.load %arg6[%c16, %c0_9] : memref<72x768xbf16, #tpu.memory_space<vmem>>, vector<8x384xbf16>
    tpu.vector_store %arg6[%c16, %c0_9], %10 {strides = array<i32>} : memref<72x768xbf16, #tpu.memory_space<vmem>>, vector<8x384xbf16>,
    %c0_10 = arith.constant 0 : index
    %c0_11 = arith.constant 0 : index
    %c18 = arith.constant 18 : index
    %12 = vector.load %arg4[%c0_10, %c0_11, %c18] : memref<2x8x512xf32, #tpu.memory_space<vmem>>, vector<1x8x384xf32>
    %13 = vector.shape_cast %12 : vector<1x8x384xf32> to vector<8x384xf32>
    %14 = arith.truncf %13 : vector<8x384xf32> to vector<8x384xbf16>
    %c24 = arith.constant 24 : index
    %c0_12 = arith.constant 0 : index
    %15 = vector.load %arg6[%c24, %c0_12] : memref<72x768xbf16, #tpu.memory_space<vmem>>, vector<8x384xbf16>
    tpu.vector_store %arg6[%c24, %c0_12], %14 {strides = array<i32>} : memref<72x768xbf16, #tpu.memory_space<vmem>>, vector<8x384xbf16>,
    %c0_13 = arith.constant 0 : index
    %c0_14 = arith.constant 0 : index
    %c19 = arith.constant 19 : index
    %16 = vector.load %arg4[%c0_13, %c0_14, %c19] : memref<2x8x512xf32, #tpu.memory_space<vmem>>, vector<1x8x384xf32>
    %17 = vector.shape_cast %16 : vector<1x8x384xf32> to vector<8x384xf32>
    %18 = arith.truncf %17 : vector<8x384xf32> to vector<8x384xbf16>
    %c32 = arith.constant 32 : index
    %c0_15 = arith.constant 0 : index
    %19 = vector.load %arg6[%c32, %c0_15] : memref<72x768xbf16, #tpu.memory_space<vmem>>, vector<8x384xbf16>
    tpu.vector_store %arg6[%c32, %c0_15], %18 {strides = array<i32>} : memref<72x768xbf16, #tpu.memory_space<vmem>>, vector<8x384xbf16>,
    %c0_16 = arith.constant 0 : index
    %c0_17 = arith.constant 0 : index
    %c20 = arith.constant 20 : index
    %20 = vector.load %arg4[%c0_16, %c0_17, %c20] : memref<2x8x512xf32, #tpu.memory_space<vmem>>, vector<1x8x384xf32>
    %21 = vector.shape_cast %20 : vector<1x8x384xf32> to vector<8x384xf32>
    %22 = arith.truncf %21 : vector<8x384xf32> to vector<8x384xbf16>
    %c40 = arith.constant 40 : index
    %c0_18 = arith.constant 0 : index
    %23 = vector.load %arg6[%c40, %c0_18] : memref<72x768xbf16, #tpu.memory_space<vmem>>, vector<8x384xbf16>
    tpu.vector_store %arg6[%c40, %c0_18], %22 {strides = array<i32>} : memref<72x768xbf16, #tpu.memory_space<vmem>>, vector<8x384xbf16>,
    %c0_19 = arith.constant 0 : index
    %c0_20 = arith.constant 0 : index
    %c36 = arith.constant 36 : index
    %24 = vector.load %arg4[%c0_19, %c0_20, %c36] : memref<2x8x512xf32, #tpu.memory_space<vmem>>, vector<1x8x384xf32>
    %25 = vector.shape_cast %24 : vector<1x8x384xf32> to vector<8x384xf32>
    %26 = arith.truncf %25 : vector<8x384xf32> to vector<8x384xbf16>
    %c48 = arith.constant 48 : index
    %c0_21 = arith.constant 0 : index
    %27 = vector.load %arg6[%c48, %c0_21] : memref<72x768xbf16, #tpu.memory_space<vmem>>, vector<8x384xbf16>
    tpu.vector_store %arg6[%c48, %c0_21], %26 {strides = array<i32>} : memref<72x768xbf16, #tpu.memory_space<vmem>>, vector<8x384xbf16>,
    %c0_22 = arith.constant 0 : index
    %c0_23 = arith.constant 0 : index
    %c37 = arith.constant 37 : index
    %28 = vector.load %arg4[%c0_22, %c0_23, %c37] : memref<2x8x512xf32, #tpu.memory_space<vmem>>, vector<1x8x384xf32>
    %29 = vector.shape_cast %28 : vector<1x8x384xf32> to vector<8x384xf32>
    %30 = arith.truncf %29 : vector<8x384xf32> to vector<8x384xbf16>
    %c56 = arith.constant 56 : index
    %c0_24 = arith.constant 0 : index
    %31 = vector.load %arg6[%c56, %c0_24] : memref<72x768xbf16, #tpu.memory_space<vmem>>, vector<8x384xbf16>
    tpu.vector_store %arg6[%c56, %c0_24], %30 {strides = array<i32>} : memref<72x768xbf16, #tpu.memory_space<vmem>>, vector<8x384xbf16>,
    %c0_25 = arith.constant 0 : index
    %c0_26 = arith.constant 0 : index
    %c38 = arith.constant 38 : index
    %32 = vector.load %arg4[%c0_25, %c0_26, %c38] : memref<2x8x512xf32, #tpu.memory_space<vmem>>, vector<1x8x384xf32>
    %33 = vector.shape_cast %32 : vector<1x8x384xf32> to vector<8x384xf32>
    %34 = arith.truncf %33 : vector<8x384xf32> to vector<8x384xbf16>
    %c64 = arith.constant 64 : index
    %c0_27 = arith.constant 0 : index
    %35 = vector.load %arg6[%c64, %c0_27] : memref<72x768xbf16, #tpu.memory_space<vmem>>, vector<8x384xbf16>
    tpu.vector_store %arg6[%c64, %c0_27], %34 {strides = array<i32>} : memref<72x768xbf16, #tpu.memory_space<vmem>>, vector<8x384xbf16>,
    %c1_28 = arith.constant 1 : index
    %c0_29 = arith.constant 0 : index
    %c0_30 = arith.constant 0 : index
    %36 = vector.load %arg4[%c1_28, %c0_29, %c0_30] : memref<2x8x512xf32, #tpu.memory_space<vmem>>, vector<1x8x384xf32>
    %37 = vector.shape_cast %36 : vector<1x8x384xf32> to vector<8x384xf32>
    %38 = arith.truncf %37 : vector<8x384xf32> to vector<8x384xbf16>
    %c0_31 = arith.constant 0 : index
    %c384 = arith.constant 384 : index
    %39 = vector.load %arg6[%c0_31, %c384] : memref<72x768xbf16, #tpu.memory_space<vmem>>, vector<8x384xbf16>
    tpu.vector_store %arg6[%c0_31, %c384], %38 {strides = array<i32>} : memref<72x768xbf16, #tpu.memory_space<vmem>>, vector<8x384xbf16>,
    %c1_32 = arith.constant 1 : index
    %c0_33 = arith.constant 0 : index
    %c1_34 = arith.constant 1 : index
    %40 = vector.load %arg4[%c1_32, %c0_33, %c1_34] : memref<2x8x512xf32, #tpu.memory_space<vmem>>, vector<1x8x384xf32>
    %41 = vector.shape_cast %40 : vector<1x8x384xf32> to vector<8x384xf32>
    %42 = arith.truncf %41 : vector<8x384xf32> to vector<8x384xbf16>
    %c8_35 = arith.constant 8 : index
    %c384_36 = arith.constant 384 : index
    %43 = vector.load %arg6[%c8_35, %c384_36] : memref<72x768xbf16, #tpu.memory_space<vmem>>, vector<8x384xbf16>
    tpu.vector_store %arg6[%c8_35, %c384_36], %42 {strides = array<i32>} : memref<72x768xbf16, #tpu.memory_space<vmem>>, vector<8x384xbf16>,
    %c1_37 = arith.constant 1 : index
    %c0_38 = arith.constant 0 : index
    %c2_39 = arith.constant 2 : index
    %44 = vector.load %arg4[%c1_37, %c0_38, %c2_39] : memref<2x8x512xf32, #tpu.memory_space<vmem>>, vector<1x8x384xf32>
    %45 = vector.shape_cast %44 : vector<1x8x384xf32> to vector<8x384xf32>
    %46 = arith.truncf %45 : vector<8x384xf32> to vector<8x384xbf16>
    %c16_40 = arith.constant 16 : index
    %c384_41 = arith.constant 384 : index
    %47 = vector.load %arg6[%c16_40, %c384_41] : memref<72x768xbf16, #tpu.memory_space<vmem>>, vector<8x384xbf16>
    tpu.vector_store %arg6[%c16_40, %c384_41], %46 {strides = array<i32>} : memref<72x768xbf16, #tpu.memory_space<vmem>>, vector<8x384xbf16>,
    %c1_42 = arith.constant 1 : index
    %c0_43 = arith.constant 0 : index
    %c18_44 = arith.constant 18 : index
    %48 = vector.load %arg4[%c1_42, %c0_43, %c18_44] : memref<2x8x512xf32, #tpu.memory_space<vmem>>, vector<1x8x384xf32>
    %49 = vector.shape_cast %48 : vector<1x8x384xf32> to vector<8x384xf32>
    %50 = arith.truncf %49 : vector<8x384xf32> to vector<8x384xbf16>
    %c24_45 = arith.constant 24 : index
    %c384_46 = arith.constant 384 : index
    %51 = vector.load %arg6[%c24_45, %c384_46] : memref<72x768xbf16, #tpu.memory_space<vmem>>, vector<8x384xbf16>
    tpu.vector_store %arg6[%c24_45, %c384_46], %50 {strides = array<i32>} : memref<72x768xbf16, #tpu.memory_space<vmem>>, vector<8x384xbf16>,
    %c1_47 = arith.constant 1 : index
    %c0_48 = arith.constant 0 : index
    %c19_49 = arith.constant 19 : index
    %52 = vector.load %arg4[%c1_47, %c0_48, %c19_49] : memref<2x8x512xf32, #tpu.memory_space<vmem>>, vector<1x8x384xf32>
    %53 = vector.shape_cast %52 : vector<1x8x384xf32> to vector<8x384xf32>
    %54 = arith.truncf %53 : vector<8x384xf32> to vector<8x384xbf16>
    %c32_50 = arith.constant 32 : index
    %c384_51 = arith.constant 384 : index
    %55 = vector.load %arg6[%c32_50, %c384_51] : memref<72x768xbf16, #tpu.memory_space<vmem>>, vector<8x384xbf16>
    tpu.vector_store %arg6[%c32_50, %c384_51], %54 {strides = array<i32>} : memref<72x768xbf16, #tpu.memory_space<vmem>>, vector<8x384xbf16>,
    %c1_52 = arith.constant 1 : index
    %c0_53 = arith.constant 0 : index
    %c20_54 = arith.constant 20 : index
    %56 = vector.load %arg4[%c1_52, %c0_53, %c20_54] : memref<2x8x512xf32, #tpu.memory_space<vmem>>, vector<1x8x384xf32>
    %57 = vector.shape_cast %56 : vector<1x8x384xf32> to vector<8x384xf32>
    %58 = arith.truncf %57 : vector<8x384xf32> to vector<8x384xbf16>
    %c40_55 = arith.constant 40 : index
    %c384_56 = arith.constant 384 : index
    %59 = vector.load %arg6[%c40_55, %c384_56] : memref<72x768xbf16, #tpu.memory_space<vmem>>, vector<8x384xbf16>
    tpu.vector_store %arg6[%c40_55, %c384_56], %58 {strides = array<i32>} : memref<72x768xbf16, #tpu.memory_space<vmem>>, vector<8x384xbf16>,
    %c1_57 = arith.constant 1 : index
    %c0_58 = arith.constant 0 : index
    %c36_59 = arith.constant 36 : index
    %60 = vector.load %arg4[%c1_57, %c0_58, %c36_59] : memref<2x8x512xf32, #tpu.memory_space<vmem>>, vector<1x8x384xf32>
    %61 = vector.shape_cast %60 : vector<1x8x384xf32> to vector<8x384xf32>
    %62 = arith.truncf %61 : vector<8x384xf32> to vector<8x384xbf16>
    %c48_60 = arith.constant 48 : index
    %c384_61 = arith.constant 384 : index
    %63 = vector.load %arg6[%c48_60, %c384_61] : memref<72x768xbf16, #tpu.memory_space<vmem>>, vector<8x384xbf16>
    tpu.vector_store %arg6[%c48_60, %c384_61], %62 {strides = array<i32>} : memref<72x768xbf16, #tpu.memory_space<vmem>>, vector<8x384xbf16>,
    %c1_62 = arith.constant 1 : index
    %c0_63 = arith.constant 0 : index
    %c37_64 = arith.constant 37 : index
    %64 = vector.load %arg4[%c1_62, %c0_63, %c37_64] : memref<2x8x512xf32, #tpu.memory_space<vmem>>, vector<1x8x384xf32>
    %65 = vector.shape_cast %64 : vector<1x8x384xf32> to vector<8x384xf32>
    %66 = arith.truncf %65 : vector<8x384xf32> to vector<8x384xbf16>
    %c56_65 = arith.constant 56 : index
    %c384_66 = arith.constant 384 : index
    %67 = vector.load %arg6[%c56_65, %c384_66] : memref<72x768xbf16, #tpu.memory_space<vmem>>, vector<8x384xbf16>
    tpu.vector_store %arg6[%c56_65, %c384_66], %66 {strides = array<i32>} : memref<72x768xbf16, #tpu.memory_space<vmem>>, vector<8x384xbf16>,
    %c1_67 = arith.constant 1 : index
    %c0_68 = arith.constant 0 : index
    %c38_69 = arith.constant 38 : index
    %68 = vector.load %arg4[%c1_67, %c0_68, %c38_69] : memref<2x8x512xf32, #tpu.memory_space<vmem>>, vector<1x8x384xf32>
    %69 = vector.shape_cast %68 : vector<1x8x384xf32> to vector<8x384xf32>
    %70 = arith.truncf %69 : vector<8x384xf32> to vector<8x384xbf16>
    %c64_70 = arith.constant 64 : index
    %c384_71 = arith.constant 384 : index
    %71 = vector.load %arg6[%c64_70, %c384_71] : memref<72x768xbf16, #tpu.memory_space<vmem>>, vector<8x384xbf16>
    tpu.vector_store %arg6[%c64_70, %c384_71], %70 {strides = array<i32>} : memref<72x768xbf16, #tpu.memory_space<vmem>>, vector<8x384xbf16>,
    %c0_72 = arith.constant 0 : index
    %c0_73 = arith.constant 0 : index
    %72 = vector.load %arg2[%c0_72, %c0_73] : memref<32x72xbf16, #tpu.memory_space<vmem>>, vector<32x72xbf16>
    %c0_74 = arith.constant 0 : index
    %c0_75 = arith.constant 0 : index
    %73 = vector.load %arg6[%c0_74, %c0_75] : memref<72x768xbf16, #tpu.memory_space<vmem>>, vector<72x768xbf16>
    %cst = arith.constant dense<0.000000e+00> : vector<32x768xf32>
    %74 = tpu.matmul %72, %73, %cst {dimension_numbers = #tpu.dot_dimension_numbers<[1], [0], [0], [1], [0, 0, 1, 1], [], []>} : vector<32x72xbf16>, vector<72x768xbf16>, vector<32x768xf32> -> vector<32x768xf32>
    %c0_76 = arith.constant 0 : index
    %c0_77 = arith.constant 0 : index
    %75 = vector.load %arg3[%c0_76, %c0_77] : memref<32x1xf32, #tpu.memory_space<vmem>>, vector<32x1xf32>
    %76 = vector.broadcast %75 : vector<32x1xf32> to vector<32x768xf32>
    %77 = arith.addf %74, %76 : vector<32x768xf32>
    %78 = vector.extract_strided_slice %77 {offsets = [0, 0], sizes = [32, 384], strides = [1, 1]} : vector<32x768xf32> to vector<32x384xf32>
    %c0_78 = arith.constant 0 : index
    %c0_79 = arith.constant 0 : index
    %c0_80 = arith.constant 0 : index
    %79 = vector.load %arg5[%c0_78, %c0_79, %c0_80] : memref<2x32x384xf32, #tpu.memory_space<vmem>>, vector<1x32x384xf32>
    %80 = vector.shape_cast %79 : vector<1x32x384xf32> to vector<32x384xf32>
    %81 = vector.shape_cast %78 : vector<32x384xf32> to vector<1x32x384xf32>
    tpu.vector_store %arg5[%c0_78, %c0_79, %c0_80], %81 {strides = array<i32>} : memref<2x32x384xf32, #tpu.memory_space<vmem>>, vector<1x32x384xf32>,
    %82 = vector.extract_strided_slice %77 {offsets = [0, 384], sizes = [32, 384], strides = [1, 1]} : vector<32x768xf32> to vector<32x384xf32>
    %c1_81 = arith.constant 1 : index
    %c0_82 = arith.constant 0 : index
    %c0_83 = arith.constant 0 : index
    %83 = vector.load %arg5[%c1_81, %c0_82, %c0_83] : memref<2x32x384xf32, #tpu.memory_space<vmem>>, vector<1x32x384xf32>
    %84 = vector.shape_cast %83 : vector<1x32x384xf32> to vector<32x384xf32>
    %85 = vector.shape_cast %82 : vector<32x384xf32> to vector<1x32x384xf32>
    tpu.vector_store %arg5[%c1_81, %c0_82, %c0_83], %85 {strides = array<i32>} : memref<2x32x384xf32, #tpu.memory_space<vmem>>, vector<1x32x384xf32>,
    return
  }
  func.func @transform_0(%arg0: i32, %arg1: i32) -> (i32, i32) {
    %c0_i32 = arith.constant 0 : i32
    %c0_i32_0 = arith.constant 0 : i32
    return %arg1, %c0_i32 : i32, i32
  }
  func.func @transform_1(%arg0: i32, %arg1: i32) -> (i32, i32) {
    %c0_i32 = arith.constant 0 : i32
    %c0_i32_0 = arith.constant 0 : i32
    return %arg1, %c0_i32 : i32, i32
  }
  func.func @transform_2(%arg0: i32, %arg1: i32) -> (i32, i32, i32) {
    %c0_i32 = arith.constant 0 : i32
    %c0_i32_0 = arith.constant 0 : i32
    %c0_i32_1 = arith.constant 0 : i32
    return %arg0, %c0_i32, %c0_i32_0 : i32, i32, i32
  }
  func.func @transform_3(%arg0: i32, %arg1: i32) -> (i32, i32, i32) {
    %c0_i32 = arith.constant 0 : i32
    %c0_i32_0 = arith.constant 0 : i32
    return %arg0, %arg1, %c0_i32 : i32, i32, i32
  }
}

</mosaic_0001>

<bundles_post_ra>
// kernel: tpu_custom_call.1
= control target key start
LH: loop header
LB: loop body
LE: loop exit
PB: predicated region body
PF: predicated region fallthrough
CT: control target
= control target key end

     0   :  { %8 = vsyncpa [#allocation4], 0  ;;  %s1375_s0 = inlined_call_operand.vmem [shape: bf16[32,72], index: 0, kind: input, shape index: {}]   ;;  %s1376_s1 = inlined_call_operand.vmem [shape: f32[32,1], index: 1, kind: input, shape index: {}]   ;;  %s1377_s2 = inlined_call_operand.hbm [shape: f32[2,8,512], index: 2, kind: input, shape index: {}]   ;;  %s1378_s3 = inlined_call_operand.hbm [shape: f32[2,32,384], index: 3, kind: output, shape index: {}]  }
   0x1   :  { %9 = vsyncpa [#allocation5], 0  ;;  %s1217_s12 = smov [#allocation3]   ;;  %s1169_s16 = scalar_lea.hbm %s1377_s2, 1024 }
   0x2   :  { %s19_s13 = sshll.u32 %s1217_s12, 4  ;;  %p1170_p0 = scmp.ne.s32.totalorder %s1377_s2, %s1169_s16  ;;  %s20_s13 = int_to_ptr.vmem [resolvable:$true] %s19_s13 }
   0x3   :  { %p1173_p1 = scmp.lt.u32.totalorder %s1169_s16, %s1377_s2 }
   0x5   :  { %p1175_p2 = pnand %p1173_p1, %p1170_p0 }
   0x7   :  { %1178 = shalt.err (!%p1175_p2)
}
   0x8   :  { %s1179_s21 = scalar_lea.vmem %s20_s13, 1024  ;;  %p1184_p4 = scmp.lt.s32.totalorder %s20_s13, %s20_s13 }
   0x9   :  { %p1180_p3 = scmp.ne.s32.totalorder %s20_s13, %s1179_s21  ;;  %p1185_p5 = scmp.lt.s32.totalorder %s1179_s21, %s1179_s21 }
   0xb   :  { %p1186_p6 = por %p1185_p5, %p1184_p4 }
   0xd   :  { %p1187_p7 = pnand %p1186_p6, %p1180_p3 }
   0xf   :  { %1190 = shalt.err (!%p1187_p7)
}
  0x10   :  { %s1218_s22 = smov 512   ;;  %s1219_s23 = smov 32  }
  0x11   :  { %25 = dma.hbm_to_vmem [thread:$0]  %s1377_s2, 1024, %s20_s13, [#allocation4], %s1218_s22, %s1218_s22, %s1219_s23  }
  0x12   :  { %1213 = dma.done.wait [#allocation4], 1024  }
  0x13   :  { %1214 = vsyncadd [#allocation4], 4294966272  ;;  %v324_v0 = vld [vmem:[#allocation3 + $0x20] sm:$0xff]  ;;  %v325_v1 = vld [vmem:[#allocation3 + $0x28] sm:$0xff]  ;;  %s1220_s26 = smov 127   ;;  %s1221_s2 = smov 126  }
  0x14   :  { %v48_v2 = vld [vmem:[#allocation3] sm:$0xff]  ;;  %v1096_v3 = vpack.c.bf16 %v325_v1, %v324_v0  ;;  %v49_v4 = vld [vmem:[#allocation3 + $0x8] sm:$0xff]  ;;  %v326_v5 = vld [vmem:[#allocation3 + $0x30] sm:$0xff]  ;;  %s1222_s27 = smov 110   ;;  %s1223_s28 = smov 109   ;;  %v1227_v14 = vmov 0  }
  0x15   :  { %v327_v6 = vld [vmem:[#allocation3 + $0x38] sm:$0xff]  ;;  %v1264_v7 = vpack.c.bf16 %v49_v4, %v48_v2  ;;  %v50_v8 = vld [vmem:[#allocation3 + $0x10] sm:$0xff]  ;;  %v1095_v10 = vpack.c.bf16 %v326_v5, %v326_v5  ;;  %s1224_s29 = smov 108   ;;  %s1225_s30 = smov 92   ;;  %830 = vmatprep.mubr.bf16.mxu0 %v1227_v14  ;;  %883 = vmatprep.mubr.bf16.mxu1 %v1227_v14  ;;  %v603_v16 = vld [vmem:[%s1376_s1] sm:$0xff]  ;;  %vm72_vm0 = vcmask 1043456  }
  0x16   :  { %v51_v9 = vld [vmem:[#allocation3 + $0x18] sm:$0xff]  ;;  %342 = vrot.lane.b32.xlu1 %v1096_v3, %s1220_s26  ;;  %v1097_v11 = vpack.c.bf16 %v327_v6, %v326_v5  ;;  %v1077_v12 = vpack.c.bf16 %v50_v8, %v50_v8  ;;  %322 = vst [vmem:[#allocation2 + $0xc] sm:$0xff] %v1096_v3  ;;  %s1226_s4 = smov 91   ;;  %1137 = vset.pattern.permute.xlu0 %v1227_v14  ;;  %s1228_s5 = smov 90   ;;  %v604_v15 = vld [vmem:[%s1376_s1 + $0x8] sm:$0xff]  ;;  %v606_v18 = vld [vmem:[%s1376_s1 + $0x18] sm:$0xff] }
  0x17   :  { %66 = vrot.lane.b32.xlu0 %v1264_v7, %s1220_s26  ;;  %v1079_v13 = vpack.c.bf16 %v51_v9, %v50_v8  ;;  %323 = vst [vmem:[#allocation2 + $0x14] sm:$0xf] %v1095_v10  ;;  %1138 = vset.pattern.permute.xlu1 %v1227_v14  ;;  %v605_v17 = vld [vmem:[%s1376_s1 + $0x10] sm:$0xff]  ;;  %vm74_vm1 = vcmask 1039360   ;;  %vm106_vm2 = vcmask 1031168   ;;  %vm138_vm3 = vcmask 900096  }
  0x18   :  { %47 = vst [vmem:[#allocation2 + $0x8] sm:$0xf] %v1077_v12  ;;  %vm170_vm4 = vcmask 891904   ;;  %vm202_vm5 = vcmask 883712   ;;  %vm234_vm6 = vcmask 752640   ;;  %vm266_vm7 = vcmask 744448  }
  0x19   :  { %vm298_vm8 = vcmask 736256   ;;  %vm772_vm9 = vcmask 588800  }
  0x1a   :  { %344 = vrot.lane.b32.xlu1 %v1097_v11, %s1220_s26 }
  0x1b   :  { %68 = vrot.lane.b32.xlu0 %v1079_v13, %s1220_s26 }
  0x1e   :  { %101 = vrot.lane.b32.xlu1 %v1079_v13, %s1221_s2 }
  0x1f   :  { %99 = vrot.lane.b32.xlu0 %v1264_v7, %s1221_s2 }
  0x22   :  { %133 = vrot.lane.b32.xlu1 %v1079_v13, %s1222_s27 }
  0x23   :  { %131 = vrot.lane.b32.xlu0 %v1264_v7, %s1222_s27 }
  0x26   :  { %375 = vrot.lane.b32.xlu1 %v1097_v11, %s1221_s2 }
  0x27   :  { %373 = vrot.lane.b32.xlu0 %v1096_v3, %s1221_s2 }
  0x2a   :  { %406 = vrot.lane.b32.xlu1 %v1097_v11, %s1222_s27 }
  0x2b   :  { %404 = vrot.lane.b32.xlu0 %v1096_v3, %s1222_s27 }
  0x2e   :  { %165 = vrot.lane.b32.xlu1 %v1079_v13, %s1223_s28 }
  0x2f   :  { %163 = vrot.lane.b32.xlu0 %v1264_v7, %s1223_s28 }
  0x32   :  { %197 = vrot.lane.b32.xlu1 %v1079_v13, %s1224_s29 }
  0x33   :  { %195 = vrot.lane.b32.xlu0 %v1264_v7, %s1224_s29 }
  0x36   :  { %437 = vrot.lane.b32.xlu1 %v1097_v11, %s1223_s28 }
  0x37   :  { %435 = vrot.lane.b32.xlu0 %v1096_v3, %s1223_s28 }
  0x3a   :  { %468 = vrot.lane.b32.xlu1 %v1097_v11, %s1224_s29 }
  0x3b   :  { %466 = vrot.lane.b32.xlu0 %v1096_v3, %s1224_s29 }
  0x3e   :  { %229 = vrot.lane.b32.xlu1 %v1079_v13, %s1225_s30 }
  0x3f   :  { %227 = vrot.lane.b32.xlu0 %v1264_v7, %s1225_s30 }
  0x42   :  { %261 = vrot.lane.b32.xlu1 %v1079_v13, %s1226_s4 }
  0x43   :  { %259 = vrot.lane.b32.xlu0 %v1264_v7, %s1226_s4 }
  0x46   :  { %499 = vrot.lane.b32.xlu1 %v1097_v11, %s1225_s30 }
  0x47   :  { %497 = vrot.lane.b32.xlu0 %v1096_v3, %s1225_s30 }
  0x4a   :  { %530 = vrot.lane.b32.xlu1 %v1097_v11, %s1226_s4 }
  0x4b   :  { %528 = vrot.lane.b32.xlu0 %v1096_v3, %s1226_s4 }
  0x4e   :  { %293 = vrot.lane.b32.xlu1 %v1079_v13, %s1228_s5 }
  0x4f   :  { %291 = vrot.lane.b32.xlu0 %v1264_v7, %s1228_s5 }
  0x52   :  { %561 = vrot.lane.b32.xlu1 %v1097_v11, %s1228_s5 }
  0x53   :  { %559 = vrot.lane.b32.xlu0 %v1096_v3, %s1228_s5 }
  0x56   :  { %614 = vperm.xlu1 %1138, %v604_v15  }
  0x57   :  { %609 = vperm.xlu0 %1137, %v603_v16  }
  0x5a   :  { %619 = vperm.xlu1 %1138, %v605_v17  }
  0x5b   :  { %624 = vperm.xlu0 %1137, %v606_v18  }
  0x88   :  { %v343_v19 = vpop.permute.xlu1 %342 }
  0x89   :  { %v67_v20 = vpop.permute.xlu0 %66  ;;  %v346_v22 = vrot.slane %v343_v19, 4 }
  0x8a   :  { %v70_v25 = vrot.slane %v67_v20, 4 }
  0x8c   :  { %v345_v21 = vpop.permute.xlu1 %344 }
  0x8d   :  { %v347_v23 = vrot.slane %v345_v21, 4  ;;  %v69_v24 = vpop.permute.xlu0 %68 }
  0x8e   :  { %v71_v26 = vrot.slane %v69_v24, 4 }
  0x8f   :  { %v348_v27 = vsel %vm72_vm0, %v346_v22, %v347_v23  ;;  %v350_v28 = vsel %vm74_vm1, %v345_v21, %v347_v23 }
  0x90   :  { %v349_v29 = vsel %vm74_vm1, %v343_v19, %v348_v27  ;;  %354 = vst [vmem:[#allocation2 + $0x2c] sm:$0xf] %v350_v28  ;;  %v73_v30 = vsel %vm72_vm0, %v70_v25, %v71_v26  ;;  %v76_v31 = vsel %vm74_vm1, %v69_v24, %v71_v26  ;;  %v102_v32 = vpop.permute.xlu1 %101 }
  0x91   :  { %353 = vst [vmem:[#allocation2 + $0x24] sm:$0xff] %v349_v29  ;;  %v75_v33 = vsel %vm74_vm1, %v67_v20, %v73_v30  ;;  %80 = vst [vmem:[#allocation2 + $0x20] sm:$0xf] %v76_v31  ;;  %v104_v34 = vrot.slane %v102_v32, 4  ;;  %v100_v35 = vpop.permute.xlu0 %99 }
  0x92   :  { %v103_v36 = vrot.slane %v100_v35, 4  ;;  %v1038_v37 = vcombine.high %v1264_v7, %v75_v33  ;;  %v1037_v38 = vcombine.low %v1264_v7, %v75_v33 }
  0x93   :  { %v108_v39 = vsel %vm106_vm2, %v102_v32, %v104_v34 }
  0x94   :  { %112 = vst [vmem:[#allocation2 + $0x38] sm:$0xf] %v108_v39  ;;  %v105_v40 = vsel %vm72_vm0, %v103_v36, %v104_v34  ;;  %v134_v41 = vpop.permute.xlu1 %133  ;;  %798 = vmatprep.subr.bf16.mxu0 %v1038_v37 }
  0x95   :  { %v107_v42 = vsel %vm106_vm2, %v100_v35, %v105_v40  ;;  %v136_v43 = vrot.slane %v134_v41, 4  ;;  %v132_v44 = vpop.permute.xlu0 %131  ;;  %799 = vmatpush1.bf16.msra.mxu0 %v1037_v38 }
  0x96   :  { %v135_v45 = vrot.slane %v132_v44, 4 }
  0x97   :  { %v140_v46 = vsel %vm138_vm3, %v134_v41, %v136_v43 }
  0x98   :  { %144 = vst [vmem:[#allocation2 + $0x50] sm:$0xf] %v140_v46  ;;  %v137_v47 = vsel %vm72_vm0, %v135_v45, %v136_v43  ;;  %v376_v48 = vpop.permute.xlu1 %375  ;;  %v1139_v49 = vld [vmem:[#allocation2 + $0xc] ss:$24 sps:$4 sm:$0xff]   ;;  %v1141_v50 = vld [vmem:[#allocation2 + $0x8] ss:$24 sps:$4 sm:$0xff]  }
  0x99   :  { %v139_v51 = vsel %vm138_vm3, %v132_v44, %v137_v47  ;;  %v378_v52 = vrot.slane %v376_v48, 4  ;;  %v374_v53 = vpop.permute.xlu0 %373  ;;  %851 = vmatprep.subr.bf16.mxu1 %v1139_v49 }
  0x9a   :  { %v377_v54 = vrot.slane %v374_v53, 4  ;;  %v1044_v55 = vcombine.high %v107_v42, %v139_v51  ;;  %v1043_v56 = vcombine.low %v107_v42, %v139_v51  ;;  %852 = vmatpush1.bf16.msra.mxu1 %v1141_v50 }
  0x9b   :  { %v381_v57 = vsel %vm106_vm2, %v376_v48, %v378_v52 }
  0x9c   :  { %385 = vst [vmem:[#allocation2 + $0x44] sm:$0xf] %v381_v57  ;;  %v379_v58 = vsel %vm72_vm0, %v377_v54, %v378_v52  ;;  %v407_v59 = vpop.permute.xlu1 %406  ;;  %800 = vmatprep.subr.bf16.mxu0 %v1044_v55 }
  0x9d   :  { %v380_v60 = vsel %vm106_vm2, %v374_v53, %v379_v58  ;;  %v409_v61 = vrot.slane %v407_v59, 4  ;;  %v405_v62 = vpop.permute.xlu0 %404  ;;  %801 = vmatpush1.bf16.msra.mxu0 %v1043_v56 }
  0x9e   :  { %384 = vst [vmem:[#allocation2 + $0x3c] sm:$0xff] %v380_v60  ;;  %v408_v63 = vrot.slane %v405_v62, 4 }
  0x9f   :  { %v412_v0 = vsel %vm138_vm3, %v407_v59, %v409_v61  ;;  %v1144_v22 = vld [vmem:[#allocation2 + $0x38] ss:$24 sps:$4 sm:$0xff]  }
  0xa0   :  { %416 = vst [vmem:[#allocation2 + $0x5c] sm:$0xf] %v412_v0  ;;  %v410_v1 = vsel %vm72_vm0, %v408_v63, %v409_v61  ;;  %v166_v2 = vpop.permute.xlu1 %165 }
  0xa1   :  { %v411_v3 = vsel %vm138_vm3, %v405_v62, %v410_v1  ;;  %v168_v4 = vrot.slane %v166_v2, 4  ;;  %v164_v5 = vpop.permute.xlu0 %163 }
  0xa2   :  { %415 = vst [vmem:[#allocation2 + $0x54] sm:$0xff] %v411_v3  ;;  %v167_v6 = vrot.slane %v164_v5, 4 }
  0xa3   :  { %v172_v7 = vsel %vm170_vm4, %v166_v2, %v168_v4 }
  0xa4   :  { %176 = vst [vmem:[#allocation2 + $0x68] sm:$0xf] %v172_v7  ;;  %v169_v8 = vsel %vm72_vm0, %v167_v6, %v168_v4  ;;  %v198_v9 = vpop.permute.xlu1 %197 }
  0xa5   :  { %v171_v10 = vsel %vm170_vm4, %v164_v5, %v169_v8  ;;  %v200_v11 = vrot.slane %v198_v9, 4  ;;  %v196_v12 = vpop.permute.xlu0 %195 }
  0xa6   :  { %v199_v13 = vrot.slane %v196_v12, 4 }
  0xa7   :  { %v204_v15 = vsel %vm202_vm5, %v198_v9, %v200_v11 }
  0xa8   :  { %208 = vst [vmem:[#allocation2 + $0x80] sm:$0xf] %v204_v15  ;;  %v201_v16 = vsel %vm72_vm0, %v199_v13, %v200_v11  ;;  %v438_v17 = vpop.permute.xlu1 %437 }
  0xa9   :  { %v203_v18 = vsel %vm202_vm5, %v196_v12, %v201_v16  ;;  %v440_v19 = vrot.slane %v438_v17, 4  ;;  %v436_v20 = vpop.permute.xlu0 %435  ;;  %v1142_v21 = vld [vmem:[#allocation2 + $0x3c] ss:$24 sps:$4 sm:$0xff]  }
  0xaa   :  { %v439_v23 = vrot.slane %v436_v20, 4  ;;  %v1050_v24 = vcombine.high %v171_v10, %v203_v18  ;;  %v1049_v25 = vcombine.low %v171_v10, %v203_v18  ;;  %853 = vmatprep.subr.bf16.mxu1 %v1142_v21  ;;  %v1153_v21 = vld [vmem:[#allocation2 + $0x14] ss:$24 sps:$4 sm:$0xff]  }
  0xab   :  { %v443_v26 = vsel %vm170_vm4, %v438_v17, %v440_v19  ;;  %854 = vmatpush1.bf16.msra.mxu1 %v1144_v22  ;;  %v1155_v22 = vld [vmem:[%s1375_s0] sm:$0xff]  }
  0xac   :  { %447 = vst [vmem:[#allocation2 + $0x74] sm:$0xf] %v443_v26  ;;  %v441_v27 = vsel %vm72_vm0, %v439_v23, %v440_v19  ;;  %v469_v28 = vpop.permute.xlu1 %468  ;;  %802 = vmatprep.subr.bf16.mxu0 %v1050_v24  ;;  %v1151_v26 = vld [vmem:[#allocation2 + $0x10] ss:$24 sps:$4 sm:$0xff]  }
  0xad   :  { %v442_v29 = vsel %vm170_vm4, %v436_v20, %v441_v27  ;;  %v471_v30 = vrot.slane %v469_v28, 4  ;;  %v467_v31 = vpop.permute.xlu0 %466  ;;  %803 = vmatpush1.bf16.msra.mxu0 %v1049_v25  ;;  %v1159_v27 = vld [vmem:[#allocation2 + $0x44] ss:$24 sps:$4 sm:$0xff]  }
  0xae   :  { %446 = vst [vmem:[#allocation2 + $0x6c] sm:$0xff] %v442_v29  ;;  %v470_v32 = vrot.slane %v467_v31, 4 }
  0xaf   :  { %v474_v33 = vsel %vm202_vm5, %v469_v28, %v471_v30  ;;  %v1147_v54 = vld [vmem:[#allocation2 + $0x68] ss:$24 sps:$4 sm:$0xff]  }
  0xb0   :  { %478 = vst [vmem:[#allocation2 + $0x8c] sm:$0xf] %v474_v33  ;;  %v472_v34 = vsel %vm72_vm0, %v470_v32, %v471_v30  ;;  %v230_v35 = vpop.permute.xlu1 %229  ;;  %v1157_v28 = vld [vmem:[#allocation2 + $0x40] ss:$24 sps:$4 sm:$0xff]   ;;  %v1166_v30 = vld [vmem:[%s1375_s0 + $0x8] sm:$0xff]   ;;  %s1229_s0 = smov [#allocation6]  }
  0xb1   :  { %v473_v36 = vsel %vm202_vm5, %v467_v31, %v472_v34  ;;  %v232_v37 = vrot.slane %v230_v35, 4  ;;  %v228_v38 = vpop.permute.xlu0 %227  ;;  %s987_s17 = sshll.u32 %s1229_s0, 4  ;;  %s988_s17 = int_to_ptr.vmem [resolvable:$true] %s987_s17 }
  0xb2   :  { %477 = vst [vmem:[#allocation2 + $0x84] sm:$0xff] %v473_v36  ;;  %v231_v39 = vrot.slane %v228_v38, 4  ;;  %s1191_s18 = scalar_lea.vmem %s988_s17, 3072  ;;  %p1196_p9 = scmp.lt.s32.totalorder %s988_s17, %s988_s17 }
  0xb3   :  { %v236_v40 = vsel %vm234_vm6, %v230_v35, %v232_v37  ;;  %p1192_p8 = scmp.ne.s32.totalorder %s988_s17, %s1191_s18  ;;  %p1197_p10 = scmp.lt.s32.totalorder %s1191_s18, %s1191_s18 }
  0xb4   :  { %240 = vst [vmem:[#allocation2 + $0x98] sm:$0xf] %v236_v40  ;;  %v233_v41 = vsel %vm72_vm0, %v231_v39, %v232_v37  ;;  %v262_v42 = vpop.permute.xlu1 %261 }
  0xb5   :  { %v235_v43 = vsel %vm234_vm6, %v228_v38, %v233_v41  ;;  %v264_v44 = vrot.slane %v262_v42, 4  ;;  %v260_v45 = vpop.permute.xlu0 %259  ;;  %p1198_p11 = por %p1197_p10, %p1196_p9 }
  0xb6   :  { %v263_v46 = vrot.slane %v260_v45, 4 }
  0xb7   :  { %v268_v47 = vsel %vm266_vm7, %v262_v42, %v264_v44  ;;  %v1162_v29 = vld [vmem:[#allocation2 + $0x74] ss:$24 sps:$4 sm:$0xff]   ;;  %p1199_p12 = pnand %p1198_p11, %p1192_p8 }
  0xb8   :  { %272 = vst [vmem:[#allocation2 + $0xb0] sm:$0xf] %v268_v47  ;;  %v265_v48 = vsel %vm72_vm0, %v263_v46, %v264_v44  ;;  %v500_v49 = vpop.permute.xlu1 %499 }
  0xb9   :  { %v267_v50 = vsel %vm266_vm7, %v260_v45, %v265_v48  ;;  %v502_v51 = vrot.slane %v500_v49, 4  ;;  %v498_v52 = vpop.permute.xlu0 %497  ;;  %v1145_v53 = vld [vmem:[#allocation2 + $0x6c] ss:$24 sps:$4 sm:$0xff]   ;;  %v1160_v34 = vld [vmem:[#allocation2 + $0x70] ss:$24 sps:$4 sm:$0xff]  }
  0xba   :  { %v501_v55 = vrot.slane %v498_v52, 4  ;;  %v1056_v56 = vcombine.high %v235_v43, %v267_v50  ;;  %v1055_v57 = vcombine.low %v235_v43, %v267_v50  ;;  %855 = vmatprep.subr.bf16.mxu1 %v1145_v53 }
  0xbb   :  { %v505_v58 = vsel %vm234_vm6, %v500_v49, %v502_v51  ;;  %856 = vmatpush1.bf16.msra.mxu1 %v1147_v54 }
  0xbc   :  { %509 = vst [vmem:[#allocation2 + $0xa4] sm:$0xf] %v505_v58  ;;  %v503_v59 = vsel %vm72_vm0, %v501_v55, %v502_v51  ;;  %v531_v60 = vpop.permute.xlu1 %530  ;;  %804 = vmatprep.subr.bf16.mxu0 %v1056_v56 }
  0xbd   :  { %v504_v61 = vsel %vm234_vm6, %v498_v52, %v503_v59  ;;  %v533_v62 = vrot.slane %v531_v60, 4  ;;  %v529_v63 = vpop.permute.xlu0 %528  ;;  %805 = vmatpush1.bf16.msra.mxu0 %v1055_v57 }
  0xbe   :  { %508 = vst [vmem:[#allocation2 + $0x9c] sm:$0xff] %v504_v61  ;;  %v532_v0 = vrot.slane %v529_v63, 4 }
  0xbf   :  { %v536_v1 = vsel %vm266_vm7, %v531_v60, %v533_v62  ;;  %v1150_v25 = vld [vmem:[#allocation2 + $0x98] ss:$24 sps:$4 sm:$0xff]  }
  0xc0   :  { %540 = vst [vmem:[#allocation2 + $0xbc] sm:$0xf] %v536_v1  ;;  %v534_v2 = vsel %vm72_vm0, %v532_v0, %v533_v62  ;;  %v294_v3 = vpop.permute.xlu1 %293 }
  0xc1   :  { %v535_v4 = vsel %vm266_vm7, %v529_v63, %v534_v2  ;;  %v296_v5 = vrot.slane %v294_v3, 4  ;;  %v292_v6 = vpop.permute.xlu0 %291 }
  0xc2   :  { %539 = vst [vmem:[#allocation2 + $0xb4] sm:$0xff] %v535_v4  ;;  %v295_v7 = vrot.slane %v292_v6, 4 }
  0xc3   :  { %v300_v8 = vsel %vm298_vm8, %v294_v3, %v296_v5 }
  0xc4   :  { %304 = vst [vmem:[#allocation2 + $0xc8] sm:$0xf] %v300_v8  ;;  %v297_v9 = vsel %vm72_vm0, %v295_v7, %v296_v5  ;;  %v562_v10 = vpop.permute.xlu1 %561 }
  0xc5   :  { %v299_v11 = vsel %vm298_vm8, %v292_v6, %v297_v9  ;;  %v564_v12 = vrot.slane %v562_v10, 4  ;;  %v560_v13 = vpop.permute.xlu0 %559 }
  0xc6   :  { %v563_v15 = vrot.slane %v560_v13, 4  ;;  %v1062_v16 = vcombine.high %v299_v11, %v299_v11  ;;  %v1061_v17 = vcombine.low %v299_v11, %v299_v11 }
  0xc7   :  { %v567_v18 = vsel %vm298_vm8, %v562_v10, %v564_v12  ;;  %v1165_v36 = vld [vmem:[#allocation2 + $0xa4] ss:$24 sps:$4 sm:$0xff]  }
  0xc8   :  { %571 = vst [vmem:[#allocation2 + $0xd4] sm:$0xf] %v567_v18  ;;  %v565_v19 = vsel %vm72_vm0, %v563_v15, %v564_v12  ;;  %1067 = vmatprep.subr.msk.bf16.mxu0 %vm72_vm0, %v1062_v16  ;;  %v781_v20 = vsel %vm72_vm0, %v1061_v17, 0 }
  0xc9   :  { %v566_v23 = vsel %vm298_vm8, %v560_v13, %v565_v19  ;;  %v1148_v24 = vld [vmem:[#allocation2 + $0x9c] ss:$24 sps:$4 sm:$0xff]   ;;  %807 = vmatpush1.bf16.msra.mxu0 %v781_v20  ;;  %v1163_v38 = vld [vmem:[#allocation2 + $0xa0] ss:$24 sps:$4 sm:$0xff]  }
  0xca   :  { %570 = vst [vmem:[#allocation2 + $0xcc] sm:$0xff] %v566_v23  ;;  %904 = vmatprep.subr.bf16.mxu0 %v1153_v21  ;;  %857 = vmatprep.subr.bf16.mxu1 %v1148_v24 }
  0xcb   :  { %858 = vmatpush1.bf16.msra.mxu1 %v1150_v25 }
  0xcc   :  { %1068 = vmatmul.mubr.msk.bf16.vlgmr.msra.gmra.mrb[0].mxu0 %vm772_vm9, %v1155_v22 }
  0xcd   :  { %905 = vmatpush1.bf16.msra.mxu0 %v1151_v26  ;;  %840 = vmatprep.mubr.bf16.mxu0 %v1227_v14 }
  0xce   :  { %906 = vmatprep.subr.bf16.mxu0 %v1159_v27 }
  0xd1   :  { %v601_v31 = vld [vmem:[#allocation2 + $0xc8] sm:$0xff]  ;;  %907 = vmatpush1.bf16.msra.mxu0 %v1157_v28  ;;  %v602_v37 = vld [vmem:[#allocation2 + $0xd0] sm:$0xff] }
  0xd2   :  { %v1064_v32 = vcombine.high %v601_v31, %v601_v31  ;;  %v1063_v33 = vcombine.low %v601_v31, %v601_v31  ;;  %908 = vmatprep.subr.bf16.mxu0 %v1162_v29  ;;  %v1066_v39 = vcombine.high %v602_v37, %v602_v37  ;;  %v1065_v40 = vcombine.low %v602_v37, %v602_v37 }
  0xd4   :  { %1070 = vmatprep.subr.msk.bf16.mxu1 %vm72_vm0, %v1064_v32  ;;  %v787_v35 = vsel %vm72_vm0, %v1063_v33, 0  ;;  %1069 = vmatmul.mubr.msk.bf16.gmra.mrb[4].mxu0 %vm772_vm9, %v1166_v30  ;;  %v793_v41 = vsel %vm72_vm0, %v1065_v40, 0 }
  0xd5   :  { %860 = vmatpush1.bf16.msra.mxu1 %v787_v35  ;;  %909 = vmatpush1.bf16.msra.mxu0 %v1160_v34  ;;  %v615_v44 = vpop.permute.xlu1 %614 }
  0xd6   :  { %1112 = vmatprep.subr.bf16.mxu1 %v1153_v21  ;;  %910 = vmatprep.subr.bf16.mxu0 %v1165_v36  ;;  %v610_v42 = vpop.permute.xlu0 %609 }
  0xd7   :  { %936 = vmatprep.mubr.bf16.mxu0 %v1227_v14 }
  0xd8   :  { %1071 = vmatmul.mubr.msk.bf16.vlgmr.msra.gmra.mrb[0].mxu1 %vm772_vm9, %v1155_v22 }
  0xd9   :  { %1117 = vmatpush1.bf16.msra.mxu1 %v1151_v26  ;;  %893 = vmatprep.mubr.bf16.mxu1 %v1227_v14 }
  0xda   :  { %1113 = vmatprep.subr.bf16.mxu1 %v1159_v27  ;;  %911 = vmatpush1.bf16.msra.mxu0 %v1163_v38  ;;  %v625_v53 = vpop.permute.xlu0 %624 }
  0xdb   :  { %1073 = vmatprep.subr.msk.bf16.mxu0 %vm72_vm0, %v1066_v39 }
  0xdd   :  { %1118 = vmatpush1.bf16.msra.mxu1 %v1157_v28 }
  0xde   :  { %1114 = vmatprep.subr.bf16.mxu1 %v1162_v29  ;;  %913 = vmatpush1.bf16.msra.mxu0 %v793_v41 }
  0xe0   :  { %1072 = vmatmul.mubr.msk.bf16.gmra.mrb[4].mxu1 %vm772_vm9, %v1166_v30 }
  0xe1   :  { %1119 = vmatpush1.bf16.msra.mxu1 %v1160_v34  ;;  %1074 = vmatmul.mubr.msk.bf16.vlgmr.msra.gmra.mrb[8].mxu0 %vm772_vm9, %v1155_v22 }
  0xe2   :  { %1115 = vmatprep.subr.bf16.mxu1 %v1165_v36  ;;  %946 = vmatprep.mubr.bf16.mxu1 %v1227_v14  ;;  %v620_v14 = vpop.permute.xlu1 %619 }
  0xe5   :  { %1120 = vmatpush1.bf16.msra.mxu1 %v1163_v38 }
  0xe6   :  { %1116 = vmatprep.subr.msk.bf16.mxu1 %vm72_vm0, %v1066_v39 }
  0xe9   :  { %1121 = vmatpush1.bf16.msra.mxu1 %v793_v41 }
  0xec   :  { %1075 = vmatmul.mubr.msk.bf16.vlgmr.msra.gmra.mrb[8].mxu1 %vm772_vm9, %v1166_v30 }
 0x19f   :  { %v832_v43 = vpop.f32.mrb[0].mxu0 }
 0x1a0   :  { %v834_v45 = vpop.f32.mrb[1].mxu0  ;;  %v833_v46 = vadd.f32 %v832_v43, %v610_v42 }
 0x1a1   :  { %v836_v47 = vpop.f32.mrb[2].mxu0  ;;  %v835_v48 = vadd.f32 %v834_v45, %v610_v42 }
 0x1a2   :  { %v837_v49 = vadd.f32 %v836_v47, %v615_v44  ;;  %957 = vst [vmem:[#allocation6] sm:$0xff] %v833_v46  ;;  %v838_v50 = vpop.f32.mrb[3].mxu0 }
 0x1a3   :  { %958 = vst [vmem:[#allocation6 + $0x8] sm:$0xff] %v835_v48  ;;  %v839_v51 = vadd.f32 %v838_v50, %v615_v44 }
 0x1a4   :  { %960 = vst [vmem:[#allocation6 + $0x18] sm:$0xff] %v837_v49 }
 0x1a5   :  { %961 = vst [vmem:[#allocation6 + $0x20] sm:$0xff] %v839_v51 }
 0x1a7   :  { %v842_v52 = vpop.f32.mrb[4].mxu0 }
 0x1a8   :  { %v844_v54 = vpop.f32.mrb[5].mxu0  ;;  %v843_v55 = vadd.f32 %v842_v52, %v620_v14 }
 0x1a9   :  { %v846_v56 = vpop.f32.mrb[6].mxu0  ;;  %v845_v57 = vadd.f32 %v844_v54, %v620_v14 }
 0x1aa   :  { %963 = vst [vmem:[#allocation6 + $0x30] sm:$0xff] %v843_v55  ;;  %v847_v58 = vadd.f32 %v846_v56, %v625_v53  ;;  %v848_v59 = vpop.f32.mrb[7].mxu0 }
 0x1ab   :  { %v885_v60 = vpop.f32.mrb[0].mxu1  ;;  %964 = vst [vmem:[#allocation6 + $0x38] sm:$0xff] %v845_v57  ;;  %v849_v61 = vadd.f32 %v848_v59, %v625_v53 }
 0x1ac   :  { %v886_v62 = vadd.f32 %v885_v60, %v610_v42  ;;  %v887_v63 = vpop.f32.mrb[1].mxu1  ;;  %966 = vst [vmem:[#allocation6 + $0x48] sm:$0xff] %v847_v58 }
 0x1ad   :  { %v888_v0 = vadd.f32 %v887_v63, %v610_v42  ;;  %v889_v1 = vpop.f32.mrb[2].mxu1  ;;  %967 = vst [vmem:[#allocation6 + $0x50] sm:$0xff] %v849_v61 }
 0x1ae   :  { %959 = vst [vmem:[#allocation6 + $0x10] sm:$0xff] %v886_v62  ;;  %v890_v2 = vadd.f32 %v889_v1, %v615_v44  ;;  %v891_v3 = vpop.f32.mrb[3].mxu1 }
 0x1af   :  { %970 = vst [vmem:[#allocation6 + $0x60] sm:$0xff] %v888_v0  ;;  %v892_v4 = vadd.f32 %v891_v3, %v615_v44 }
 0x1b0   :  { %962 = vst [vmem:[#allocation6 + $0x28] sm:$0xff] %v890_v2 }
 0x1b1   :  { %973 = vst [vmem:[#allocation6 + $0x78] sm:$0xff] %v892_v4 }
 0x1b3   :  { %v895_v5 = vpop.f32.mrb[4].mxu1 }
 0x1b4   :  { %v897_v6 = vpop.f32.mrb[5].mxu1  ;;  %v896_v7 = vadd.f32 %v895_v5, %v620_v14  ;;  %v938_v8 = vpop.f32.mrb[8].mxu0 }
 0x1b5   :  { %v899_v9 = vpop.f32.mrb[6].mxu1  ;;  %v898_v10 = vadd.f32 %v897_v6, %v620_v14  ;;  %v939_v11 = vadd.f32 %v938_v8, %v610_v42  ;;  %v940_v12 = vpop.f32.mrb[9].mxu0 }
 0x1b6   :  { %965 = vst [vmem:[#allocation6 + $0x40] sm:$0xff] %v896_v7  ;;  %v900_v13 = vadd.f32 %v899_v9, %v625_v53  ;;  %v901_v15 = vpop.f32.mrb[7].mxu1  ;;  %v941_v16 = vadd.f32 %v940_v12, %v610_v42  ;;  %v942_v17 = vpop.f32.mrb[10].mxu0 }
 0x1b7   :  { %976 = vst [vmem:[#allocation6 + $0x90] sm:$0xff] %v898_v10  ;;  %v902_v18 = vadd.f32 %v901_v15, %v625_v53  ;;  %971 = vst [vmem:[#allocation6 + $0x68] sm:$0xff] %v939_v11  ;;  %v943_v19 = vadd.f32 %v942_v17, %v615_v44  ;;  %v944_v20 = vpop.f32.mrb[11].mxu0 }
 0x1b8   :  { %968 = vst [vmem:[#allocation6 + $0x58] sm:$0xff] %v900_v13  ;;  %972 = vst [vmem:[#allocation6 + $0x70] sm:$0xff] %v941_v16  ;;  %v945_v21 = vadd.f32 %v944_v20, %v615_v44 }
 0x1b9   :  { %979 = vst [vmem:[#allocation6 + $0xa8] sm:$0xff] %v902_v18  ;;  %974 = vst [vmem:[#allocation6 + $0x80] sm:$0xff] %v943_v19 }
 0x1ba   :  { %975 = vst [vmem:[#allocation6 + $0x88] sm:$0xff] %v945_v21 }
 0x1bf   :  { %v948_v22 = vpop.f32.mrb[8].mxu1 }
 0x1c0   :  { %v949_v23 = vadd.f32 %v948_v22, %v620_v14  ;;  %v950_v24 = vpop.f32.mrb[9].mxu1 }
 0x1c1   :  { %v951_v25 = vadd.f32 %v950_v24, %v620_v14  ;;  %v952_v26 = vpop.f32.mrb[10].mxu1 }
 0x1c2   :  { %977 = vst [vmem:[#allocation6 + $0x98] sm:$0xff] %v949_v23  ;;  %v953_v27 = vadd.f32 %v952_v26, %v625_v53  ;;  %v954_v28 = vpop.f32.mrb[11].mxu1 }
 0x1c3   :  { %978 = vst [vmem:[#allocation6 + $0xa0] sm:$0xff] %v951_v25  ;;  %v955_v29 = vadd.f32 %v954_v28, %v625_v53 }
 0x1c4   :  { %980 = vst [vmem:[#allocation6 + $0xb0] sm:$0xff] %v953_v27 }
 0x1c5   :  { %981 = vst [vmem:[#allocation6 + $0xb8] sm:$0xff] %v955_v29 }
 0x1c6   :  { %1202 = shalt.err (!%p1199_p12)
}
 0x1c7   :  { %s1203_s21 = scalar_lea.hbm %s1378_s3, 3072 }
 0x1c8   :  { %p1204_p13 = scmp.ne.s32.totalorder %s1378_s3, %s1203_s21  ;;  %p1207_p0 = scmp.lt.u32.totalorder %s1203_s21, %s1378_s3 }
 0x1ca   :  { %p1209_p1 = pnand %p1207_p0, %p1204_p13 }
 0x1cc   :  { %1212 = shalt.err (!%p1209_p1)
}
 0x1cd   :  { %s1230_s26 = smov 384   ;;  %s1231_s2 = smov 24  }
 0x1ce   :  { %993 = dma.vmem_to_hbm [thread:$0]  %s988_s17, 3072, %s1378_s3, [#allocation5], %s1230_s26, %s1230_s26, %s1231_s2  }
 0x1cf   :  { %1215 = dma.done.wait [#allocation5], 3072  }
 0x1d0   :  { %1216 = vsyncadd [#allocation5], 4294964224 }
 0x1d1   :  { %997 = vsyncpa [#allocation4], 1 }
 0x1d2   :  { %998 = vsyncpa [#allocation5], 1 }

</bundles_post_ra>
